<compile_context>
chip_gen: v7x
topology: tpu7x:2x2x1
jax: 0.10.0
libtpu: 0.0.40
codegen_flags: <defaults>
</compile_context>

<pallas_src>
import functools

import jax
import jax.numpy as jnp
from jax import lax
from jax.experimental import pallas as pl
from jax.experimental.pallas import tpu as pltpu


# ----------------------------------------------------------------------------
# Fused kernel: LSTM over time + avg/max pooling + siamese feature head + fc.
# ----------------------------------------------------------------------------
def _textrnn_kernel(n_steps,
                    x_ref,       # [N*2B, V]  time-major-flattened embeddings (f32)
                    w_ih_ref,    # [V, 4H]
                    w_hh_ref,    # [H, 4H]
                    b_ref,       # [1, 4H]    b_ih + b_hh
                    w1_ref,      # [4, H, FC] fc1 weight row-blocks
                    b1_ref,      # [1, FC]
                    w2_ref,      # [FC, 1]
                    b2fc_ref,    # [1, 1]
                    out_ref):    # [B, 1]
    rows, _ = x_ref.shape
    b2 = rows // n_steps                 # 2 * batch (both siamese branches)
    batch = b2 // 2
    h_dim = w_hh_ref.shape[0]

    w_hh = w_hh_ref[...]

    # ---- hoisted input projection: ONE big MXU call + bias fold (out of loop) ----
    xw = (jnp.dot(x_ref[...], w_ih_ref[...], preferred_element_type=jnp.float32)
          + b_ref[...])                                           # [N*2B, 4H]

    h = jnp.zeros((b2, h_dim), jnp.float32)
    c = jnp.zeros((b2, h_dim), jnp.float32)
    s = jnp.zeros((b2, h_dim), jnp.float32)
    m = jnp.full((b2, h_dim), -jnp.inf, jnp.float32)   # n_steps >= 1 assumed

    # ---- fully unrolled recurrence (n_steps is a compile-time constant) ----------
    # Single h @ W_hh push per step keeps the MXU N-dim at 4H (=128 when H=32);
    # the per-gate slices below are static slices of that one result vreg.
    for t in range(n_steps):
        gates = (xw[t * b2:(t + 1) * b2, :]
                 + jnp.dot(h, w_hh, preferred_element_type=jnp.float32))  # [2B, 4H]
        i_g = jax.nn.sigmoid(gates[:, 0 * h_dim:1 * h_dim])
        f_g = jax.nn.sigmoid(gates[:, 1 * h_dim:2 * h_dim])
        g_g = jnp.tanh(gates[:, 2 * h_dim:3 * h_dim])
        o_g = jax.nn.sigmoid(gates[:, 3 * h_dim:4 * h_dim])
        c = f_g * c + i_g * g_g
        h = o_g * jnp.tanh(c)
        s = s + h
        m = jnp.maximum(m, h)

    avg = s * jnp.float32(1.0 / n_steps)               # F.avg_pool1d over time
    # m is the max-pool over time.

    # ---- siamese head (kept in VMEM/vregs; no lane-axis concatenation) -----------
    avg_a, avg_b = avg[:batch], avg[batch:]
    max_a, max_b = m[:batch], m[batch:]

    d1a = jnp.abs(avg_a - avg_b)                        # delta1, avg part
    d1m = jnp.abs(max_a - max_b)                        # delta1, max part

    # ||o5||^2 = ||avg||^2 + ||max||^2 (o5 = cat([avg, max]) in the reference)
    sq_a = (jnp.sum(avg_a * avg_a, axis=1, keepdims=True)
            + jnp.sum(max_a * max_a, axis=1, keepdims=True))
    sq_b = (jnp.sum(avg_b * avg_b, axis=1, keepdims=True)
            + jnp.sum(max_b * max_b, axis=1, keepdims=True))
    # rsqrt on the EUP slot; eps guards the all-zero-row NaN hazard of the reference.
    inv_ab = lax.rsqrt(sq_a + 1e-12) * lax.rsqrt(sq_b + 1e-12)
    d2a = (avg_a * avg_b) * inv_ab                      # delta2, avg part
    d2m = (max_a * max_b) * inv_ab                      # delta2, max part

    # TODO(synk): nn.Dropout(0.5) layers are identity here (inference forward).
    # fc1 as four accumulating matmuls (avoids cat([delta1, delta2], 1) relayout).
    h1 = (jnp.dot(d1a, w1_ref[0], preferred_element_type=jnp.float32)
          + jnp.dot(d1m, w1_ref[1], preferred_element_type=jnp.float32)
          + jnp.dot(d2a, w1_ref[2], preferred_element_type=jnp.float32)
          + jnp.dot(d2m, w1_ref[3], preferred_element_type=jnp.float32)
          + b1_ref[...])
    h1 = jnp.maximum(h1, 0.0)                           # ReLU
    logit = jnp.dot(h1, w2_ref[...], preferred_element_type=jnp.float32) + b2fc_ref[...]
    out_ref[...] = jax.nn.sigmoid(logit)                # [B, 1]


def textrnn_pallas(x2d, w_ih, w_hh, b_lstm, w1_blocks, fc1_b, fc2_w, fc2_b, *, n_steps):
    b2 = x2d.shape[0] // n_steps
    batch = b2 // 2
    kernel = functools.partial(_textrnn_kernel, n_steps)
    # TODO(synk): for production batch / seq-len, add a ("parallel",) batch grid
    # (v7x has 2 TensorCores) and stream the time axis in double-buffered blocks
    # sized for v7x's 64 MiB VMEM; at these demo shapes a single gridless call is
    # launch-overhead optimal.
    return pl.pallas_call(
        kernel,
        out_shape=jax.ShapeDtypeStruct((batch, 1), jnp.float32),
        in_specs=[pl.BlockSpec(memory_space=pltpu.MemorySpace.VMEM)] * 8,
        out_specs=pl.BlockSpec(memory_space=pltpu.MemorySpace.VMEM),
    )(x2d, w_ih, w_hh, b_lstm, w1_blocks, fc1_b, fc2_w, fc2_b)


# ----------------------------------------------------------------------------
# Full forward (glue: embedding gather / layout plumbing stays in plain JAX).
# ----------------------------------------------------------------------------
def textrnn_forward(x, emb_table, w_ih, w_hh, b_lstm, fc1_w, fc1_b, fc2_w, fc2_b, *, doc_len):
    tok = x[:, :, :doc_len]                                        # [B, 2, N]

    # nn.Embedding(max_norm=5): renormalize only the GATHERED rows (same forward
    # output as PyTorch's in-place renorm, but no full-vocab-table pass).
    emb = emb_table[tok]                                           # [B, 2, N, V]
    norms = jnp.sqrt(jnp.sum(emb * emb, axis=-1, keepdims=True))
    emb = emb * jnp.minimum(1.0, 5.0 / jnp.maximum(norms, 1e-7))

    batch = emb.shape[0]
    v_dim = emb.shape[-1]

    x1 = emb[:, 0]                                                 # [B, N, V]
    x2 = emb[:, 1]                                                 # [B, N, V]
    x_both = jnp.concatenate([x1, x2], axis=0)                     # [2B, N, V]
    x_tm = jnp.transpose(x_both, (1, 0, 2))                        # [N, 2B, V]
    x2d = x_tm.reshape(doc_len * 2 * batch, v_dim).astype(jnp.float32)  # [N*2B, V]

    h_dim = w_hh.shape[0]
    fc_dim = fc1_w.shape[1]
    # fc1 weight as four [H, FC] row blocks: (delta1-avg, delta1-max, delta2-avg, delta2-max)
    w1_blocks = fc1_w.reshape(4, h_dim, fc_dim)

    # x[:, 0, -1] (sta_feat index) unused since sta_feat is None.
    out = textrnn_pallas(x2d, w_ih, w_hh, b_lstm, w1_blocks, fc1_b, fc2_w, fc2_b,
                         n_steps=doc_len)                          # [B, 1]
    return out[:, 0]                                               # view(-1)


if __name__ == "__main__":
    # Small, module-consistent shapes.
    B = 2            # batch
    N = 8            # arg.doc_length
    V = 32           # arg.embed_dim
    H = 32           # arg.hidden_size  (4H = 128 lanes)
    FC = 64          # arg.fc_hiddim
    VOCAB = 50       # arg.vocab_size

    key = jax.random.PRNGKey(0)
    k = jax.random.split(key, 8)

    def xavier(kk, shape):
        fan_in, fan_out = shape
        std = (2.0 / (fan_in + fan_out)) ** 0.5
        return jax.random.normal(kk, shape, jnp.float32) * std

    emb_table = jax.random.normal(k[0], (VOCAB, V), jnp.float32)
    w_ih = xavier(k[1], (V, 4 * H))                   # xavier_normal_(lstm w_ih)
    w_hh = xavier(k[2], (H, 4 * H))                   # xavier_normal_(lstm w_hh)
    bound = 1.0 / (H ** 0.5)
    b_lstm = jax.random.uniform(k[3], (1, 4 * H), jnp.float32,
                                minval=-2 * bound, maxval=2 * bound)  # b_ih + b_hh
    fc1_w = xavier(k[4], (4 * H, FC))
    fc1_b = jax.random.uniform(k[5], (1, FC), jnp.float32, minval=-0.1, maxval=0.1)
    fc2_w = xavier(k[6], (FC, 1))
    fc2_b = jnp.zeros((1, 1), jnp.float32)

    # Input token ids: [B, 2, N+1]; last position is the sta_feat index (unused).
    x = jax.random.randint(k[7], (B, 2, N + 1), 0, VOCAB, dtype=jnp.int32)

    out = textrnn_forward(x, emb_table, w_ih, w_hh, b_lstm,
                          fc1_w, fc1_b, fc2_w, fc2_b, doc_len=N)
    out = jax.block_until_ready(out)

    assert out.shape == (B,), out.shape
    assert bool(jnp.all(jnp.isfinite(out)))
    assert bool(jnp.all((out >= 0.0) & (out <= 1.0)))
    print("KERNEL_OK")
</pallas_src>

<mosaic_0001>
module attributes {stable_mosaic.version = 11 : i64} {
  func.func @_textrnn_kernel(%arg0: memref<32x32xf32, #tpu.memory_space<vmem>>, %arg1: memref<32x128xf32, #tpu.memory_space<vmem>>, %arg2: memref<32x128xf32, #tpu.memory_space<vmem>>, %arg3: memref<1x128xf32, #tpu.memory_space<vmem>>, %arg4: memref<4x32x64xf32, #tpu.memory_space<vmem>>, %arg5: memref<1x64xf32, #tpu.memory_space<vmem>>, %arg6: memref<64x1xf32, #tpu.memory_space<vmem>>, %arg7: memref<1x1xf32, #tpu.memory_space<vmem>>, %arg8: memref<2x1xf32, #tpu.memory_space<vmem>>) attributes {dimension_semantics = [], scalar_prefetch = 0 : i64, scratch_operands = 0 : i64, tpu.core_type = #tpu.core_type<tc>} {
    %c0 = arith.constant 0 : index
    %c0_0 = arith.constant 0 : index
    %0 = vector.load %arg2[%c0, %c0_0] : memref<32x128xf32, #tpu.memory_space<vmem>>, vector<32x128xf32>
    %c0_1 = arith.constant 0 : index
    %c0_2 = arith.constant 0 : index
    %1 = vector.load %arg0[%c0_1, %c0_2] : memref<32x32xf32, #tpu.memory_space<vmem>>, vector<32x32xf32>
    %c0_3 = arith.constant 0 : index
    %c0_4 = arith.constant 0 : index
    %2 = vector.load %arg1[%c0_3, %c0_4] : memref<32x128xf32, #tpu.memory_space<vmem>>, vector<32x128xf32>
    %cst = arith.constant dense<0.000000e+00> : vector<32x128xf32>
    %3 = tpu.matmul %1, %2, %cst {dimension_numbers = #tpu.dot_dimension_numbers<[1], [0], [0], [1], [0, 0, 1, 1], [], []>} : vector<32x32xf32>, vector<32x128xf32>, vector<32x128xf32> -> vector<32x128xf32>
    %c0_5 = arith.constant 0 : index
    %c0_6 = arith.constant 0 : index
    %4 = vector.load %arg3[%c0_5, %c0_6] : memref<1x128xf32, #tpu.memory_space<vmem>>, vector<1x128xf32>
    %5 = vector.broadcast %4 : vector<1x128xf32> to vector<32x128xf32>
    %6 = arith.addf %3, %5 : vector<32x128xf32>
    %cst_7 = arith.constant 0.000000e+00 : f32
    %7 = vector.broadcast %cst_7 : f32 to vector<4x32xf32>
    %cst_8 = arith.constant 0.000000e+00 : f32
    %8 = vector.broadcast %cst_8 : f32 to vector<4x32xf32>
    %cst_9 = arith.constant 0.000000e+00 : f32
    %9 = vector.broadcast %cst_9 : f32 to vector<4x32xf32>
    %cst_10 = arith.constant 0xFF800000 : f32
    %10 = vector.broadcast %cst_10 : f32 to vector<4x32xf32>
    %11 = vector.extract_strided_slice %6 {offsets = [0, 0], sizes = [4, 128], strides = [1, 1]} : vector<32x128xf32> to vector<4x128xf32>
    %cst_11 = arith.constant dense<0.000000e+00> : vector<4x128xf32>
    %12 = tpu.matmul %7, %0, %cst_11 {dimension_numbers = #tpu.dot_dimension_numbers<[1], [0], [0], [1], [0, 0, 1, 1], [], []>} : vector<4x32xf32>, vector<32x128xf32>, vector<4x128xf32> -> vector<4x128xf32>
    %13 = arith.addf %11, %12 : vector<4x128xf32>
    %14 = vector.extract_strided_slice %13 {offsets = [0, 0], sizes = [4, 32], strides = [1, 1]} : vector<4x128xf32> to vector<4x32xf32>
    %15 = arith.negf %14 : vector<4x32xf32>
    %16 = math.exp %15 : vector<4x32xf32>
    %cst_12 = arith.constant 1.000000e+00 : f32
    %17 = vector.broadcast %cst_12 : f32 to vector<4x32xf32>
    %18 = arith.addf %17, %16 : vector<4x32xf32>
    %19 = arith.divf %17, %18 : vector<4x32xf32>
    %20 = vector.extract_strided_slice %13 {offsets = [0, 32], sizes = [4, 32], strides = [1, 1]} : vector<4x128xf32> to vector<4x32xf32>
    %21 = arith.negf %20 : vector<4x32xf32>
    %22 = math.exp %21 : vector<4x32xf32>
    %cst_13 = arith.constant 1.000000e+00 : f32
    %23 = vector.broadcast %cst_13 : f32 to vector<4x32xf32>
    %24 = arith.addf %23, %22 : vector<4x32xf32>
    %25 = arith.divf %23, %24 : vector<4x32xf32>
    %26 = vector.extract_strided_slice %13 {offsets = [0, 64], sizes = [4, 32], strides = [1, 1]} : vector<4x128xf32> to vector<4x32xf32>
    %27 = math.tanh %26 : vector<4x32xf32>
    %28 = vector.extract_strided_slice %13 {offsets = [0, 96], sizes = [4, 32], strides = [1, 1]} : vector<4x128xf32> to vector<4x32xf32>
    %29 = arith.negf %28 : vector<4x32xf32>
    %30 = math.exp %29 : vector<4x32xf32>
    %cst_14 = arith.constant 1.000000e+00 : f32
    %31 = vector.broadcast %cst_14 : f32 to vector<4x32xf32>
    %32 = arith.addf %31, %30 : vector<4x32xf32>
    %33 = arith.divf %31, %32 : vector<4x32xf32>
    %34 = arith.mulf %25, %8 : vector<4x32xf32>
    %35 = arith.mulf %19, %27 : vector<4x32xf32>
    %36 = arith.addf %34, %35 : vector<4x32xf32>
    %37 = math.tanh %36 : vector<4x32xf32>
    %38 = arith.mulf %33, %37 : vector<4x32xf32>
    %39 = arith.addf %9, %38 : vector<4x32xf32>
    %40 = arith.maximumf %10, %38 : vector<4x32xf32>
    %41 = vector.extract_strided_slice %6 {offsets = [4, 0], sizes = [4, 128], strides = [1, 1]} : vector<32x128xf32> to vector<4x128xf32>
    %cst_15 = arith.constant dense<0.000000e+00> : vector<4x128xf32>
    %42 = tpu.matmul %38, %0, %cst_15 {dimension_numbers = #tpu.dot_dimension_numbers<[1], [0], [0], [1], [0, 0, 1, 1], [], []>} : vector<4x32xf32>, vector<32x128xf32>, vector<4x128xf32> -> vector<4x128xf32>
    %43 = arith.addf %41, %42 : vector<4x128xf32>
    %44 = vector.extract_strided_slice %43 {offsets = [0, 0], sizes = [4, 32], strides = [1, 1]} : vector<4x128xf32> to vector<4x32xf32>
    %45 = arith.negf %44 : vector<4x32xf32>
    %46 = math.exp %45 : vector<4x32xf32>
    %cst_16 = arith.constant 1.000000e+00 : f32
    %47 = vector.broadcast %cst_16 : f32 to vector<4x32xf32>
    %48 = arith.addf %47, %46 : vector<4x32xf32>
    %49 = arith.divf %47, %48 : vector<4x32xf32>
    %50 = vector.extract_strided_slice %43 {offsets = [0, 32], sizes = [4, 32], strides = [1, 1]} : vector<4x128xf32> to vector<4x32xf32>
    %51 = arith.negf %50 : vector<4x32xf32>
    %52 = math.exp %51 : vector<4x32xf32>
    %cst_17 = arith.constant 1.000000e+00 : f32
    %53 = vector.broadcast %cst_17 : f32 to vector<4x32xf32>
    %54 = arith.addf %53, %52 : vector<4x32xf32>
    %55 = arith.divf %53, %54 : vector<4x32xf32>
    %56 = vector.extract_strided_slice %43 {offsets = [0, 64], sizes = [4, 32], strides = [1, 1]} : vector<4x128xf32> to vector<4x32xf32>
    %57 = math.tanh %56 : vector<4x32xf32>
    %58 = vector.extract_strided_slice %43 {offsets = [0, 96], sizes = [4, 32], strides = [1, 1]} : vector<4x128xf32> to vector<4x32xf32>
    %59 = arith.negf %58 : vector<4x32xf32>
    %60 = math.exp %59 : vector<4x32xf32>
    %cst_18 = arith.constant 1.000000e+00 : f32
    %61 = vector.broadcast %cst_18 : f32 to vector<4x32xf32>
    %62 = arith.addf %61, %60 : vector<4x32xf32>
    %63 = arith.divf %61, %62 : vector<4x32xf32>
    %64 = arith.mulf %55, %36 : vector<4x32xf32>
    %65 = arith.mulf %49, %57 : vector<4x32xf32>
    %66 = arith.addf %64, %65 : vector<4x32xf32>
    %67 = math.tanh %66 : vector<4x32xf32>
    %68 = arith.mulf %63, %67 : vector<4x32xf32>
    %69 = arith.addf %39, %68 : vector<4x32xf32>
    %70 = arith.maximumf %40, %68 : vector<4x32xf32>
    %71 = vector.extract_strided_slice %6 {offsets = [8, 0], sizes = [4, 128], strides = [1, 1]} : vector<32x128xf32> to vector<4x128xf32>
    %cst_19 = arith.constant dense<0.000000e+00> : vector<4x128xf32>
    %72 = tpu.matmul %68, %0, %cst_19 {dimension_numbers = #tpu.dot_dimension_numbers<[1], [0], [0], [1], [0, 0, 1, 1], [], []>} : vector<4x32xf32>, vector<32x128xf32>, vector<4x128xf32> -> vector<4x128xf32>
    %73 = arith.addf %71, %72 : vector<4x128xf32>
    %74 = vector.extract_strided_slice %73 {offsets = [0, 0], sizes = [4, 32], strides = [1, 1]} : vector<4x128xf32> to vector<4x32xf32>
    %75 = arith.negf %74 : vector<4x32xf32>
    %76 = math.exp %75 : vector<4x32xf32>
    %cst_20 = arith.constant 1.000000e+00 : f32
    %77 = vector.broadcast %cst_20 : f32 to vector<4x32xf32>
    %78 = arith.addf %77, %76 : vector<4x32xf32>
    %79 = arith.divf %77, %78 : vector<4x32xf32>
    %80 = vector.extract_strided_slice %73 {offsets = [0, 32], sizes = [4, 32], strides = [1, 1]} : vector<4x128xf32> to vector<4x32xf32>
    %81 = arith.negf %80 : vector<4x32xf32>
    %82 = math.exp %81 : vector<4x32xf32>
    %cst_21 = arith.constant 1.000000e+00 : f32
    %83 = vector.broadcast %cst_21 : f32 to vector<4x32xf32>
    %84 = arith.addf %83, %82 : vector<4x32xf32>
    %85 = arith.divf %83, %84 : vector<4x32xf32>
    %86 = vector.extract_strided_slice %73 {offsets = [0, 64], sizes = [4, 32], strides = [1, 1]} : vector<4x128xf32> to vector<4x32xf32>
    %87 = math.tanh %86 : vector<4x32xf32>
    %88 = vector.extract_strided_slice %73 {offsets = [0, 96], sizes = [4, 32], strides = [1, 1]} : vector<4x128xf32> to vector<4x32xf32>
    %89 = arith.negf %88 : vector<4x32xf32>
    %90 = math.exp %89 : vector<4x32xf32>
    %cst_22 = arith.constant 1.000000e+00 : f32
    %91 = vector.broadcast %cst_22 : f32 to vector<4x32xf32>
    %92 = arith.addf %91, %90 : vector<4x32xf32>
    %93 = arith.divf %91, %92 : vector<4x32xf32>
    %94 = arith.mulf %85, %66 : vector<4x32xf32>
    %95 = arith.mulf %79, %87 : vector<4x32xf32>
    %96 = arith.addf %94, %95 : vector<4x32xf32>
    %97 = math.tanh %96 : vector<4x32xf32>
    %98 = arith.mulf %93, %97 : vector<4x32xf32>
    %99 = arith.addf %69, %98 : vector<4x32xf32>
    %100 = arith.maximumf %70, %98 : vector<4x32xf32>
    %101 = vector.extract_strided_slice %6 {offsets = [12, 0], sizes = [4, 128], strides = [1, 1]} : vector<32x128xf32> to vector<4x128xf32>
    %cst_23 = arith.constant dense<0.000000e+00> : vector<4x128xf32>
    %102 = tpu.matmul %98, %0, %cst_23 {dimension_numbers = #tpu.dot_dimension_numbers<[1], [0], [0], [1], [0, 0, 1, 1], [], []>} : vector<4x32xf32>, vector<32x128xf32>, vector<4x128xf32> -> vector<4x128xf32>
    %103 = arith.addf %101, %102 : vector<4x128xf32>
    %104 = vector.extract_strided_slice %103 {offsets = [0, 0], sizes = [4, 32], strides = [1, 1]} : vector<4x128xf32> to vector<4x32xf32>
    %105 = arith.negf %104 : vector<4x32xf32>
    %106 = math.exp %105 : vector<4x32xf32>
    %cst_24 = arith.constant 1.000000e+00 : f32
    %107 = vector.broadcast %cst_24 : f32 to vector<4x32xf32>
    %108 = arith.addf %107, %106 : vector<4x32xf32>
    %109 = arith.divf %107, %108 : vector<4x32xf32>
    %110 = vector.extract_strided_slice %103 {offsets = [0, 32], sizes = [4, 32], strides = [1, 1]} : vector<4x128xf32> to vector<4x32xf32>
    %111 = arith.negf %110 : vector<4x32xf32>
    %112 = math.exp %111 : vector<4x32xf32>
    %cst_25 = arith.constant 1.000000e+00 : f32
    %113 = vector.broadcast %cst_25 : f32 to vector<4x32xf32>
    %114 = arith.addf %113, %112 : vector<4x32xf32>
    %115 = arith.divf %113, %114 : vector<4x32xf32>
    %116 = vector.extract_strided_slice %103 {offsets = [0, 64], sizes = [4, 32], strides = [1, 1]} : vector<4x128xf32> to vector<4x32xf32>
    %117 = math.tanh %116 : vector<4x32xf32>
    %118 = vector.extract_strided_slice %103 {offsets = [0, 96], sizes = [4, 32], strides = [1, 1]} : vector<4x128xf32> to vector<4x32xf32>
    %119 = arith.negf %118 : vector<4x32xf32>
    %120 = math.exp %119 : vector<4x32xf32>
    %cst_26 = arith.constant 1.000000e+00 : f32
    %121 = vector.broadcast %cst_26 : f32 to vector<4x32xf32>
    %122 = arith.addf %121, %120 : vector<4x32xf32>
    %123 = arith.divf %121, %122 : vector<4x32xf32>
    %124 = arith.mulf %115, %96 : vector<4x32xf32>
    %125 = arith.mulf %109, %117 : vector<4x32xf32>
    %126 = arith.addf %124, %125 : vector<4x32xf32>
    %127 = math.tanh %126 : vector<4x32xf32>
    %128 = arith.mulf %123, %127 : vector<4x32xf32>
    %129 = arith.addf %99, %128 : vector<4x32xf32>
    %130 = arith.maximumf %100, %128 : vector<4x32xf32>
    %131 = vector.extract_strided_slice %6 {offsets = [16, 0], sizes = [4, 128], strides = [1, 1]} : vector<32x128xf32> to vector<4x128xf32>
    %cst_27 = arith.constant dense<0.000000e+00> : vector<4x128xf32>
    %132 = tpu.matmul %128, %0, %cst_27 {dimension_numbers = #tpu.dot_dimension_numbers<[1], [0], [0], [1], [0, 0, 1, 1], [], []>} : vector<4x32xf32>, vector<32x128xf32>, vector<4x128xf32> -> vector<4x128xf32>
    %133 = arith.addf %131, %132 : vector<4x128xf32>
    %134 = vector.extract_strided_slice %133 {offsets = [0, 0], sizes = [4, 32], strides = [1, 1]} : vector<4x128xf32> to vector<4x32xf32>
    %135 = arith.negf %134 : vector<4x32xf32>
    %136 = math.exp %135 : vector<4x32xf32>
    %cst_28 = arith.constant 1.000000e+00 : f32
    %137 = vector.broadcast %cst_28 : f32 to vector<4x32xf32>
    %138 = arith.addf %137, %136 : vector<4x32xf32>
    %139 = arith.divf %137, %138 : vector<4x32xf32>
    %140 = vector.extract_strided_slice %133 {offsets = [0, 32], sizes = [4, 32], strides = [1, 1]} : vector<4x128xf32> to vector<4x32xf32>
    %141 = arith.negf %140 : vector<4x32xf32>
    %142 = math.exp %141 : vector<4x32xf32>
    %cst_29 = arith.constant 1.000000e+00 : f32
    %143 = vector.broadcast %cst_29 : f32 to vector<4x32xf32>
    %144 = arith.addf %143, %142 : vector<4x32xf32>
    %145 = arith.divf %143, %144 : vector<4x32xf32>
    %146 = vector.extract_strided_slice %133 {offsets = [0, 64], sizes = [4, 32], strides = [1, 1]} : vector<4x128xf32> to vector<4x32xf32>
    %147 = math.tanh %146 : vector<4x32xf32>
    %148 = vector.extract_strided_slice %133 {offsets = [0, 96], sizes = [4, 32], strides = [1, 1]} : vector<4x128xf32> to vector<4x32xf32>
    %149 = arith.negf %148 : vector<4x32xf32>
    %150 = math.exp %149 : vector<4x32xf32>
    %cst_30 = arith.constant 1.000000e+00 : f32
    %151 = vector.broadcast %cst_30 : f32 to vector<4x32xf32>
    %152 = arith.addf %151, %150 : vector<4x32xf32>
    %153 = arith.divf %151, %152 : vector<4x32xf32>
    %154 = arith.mulf %145, %126 : vector<4x32xf32>
    %155 = arith.mulf %139, %147 : vector<4x32xf32>
    %156 = arith.addf %154, %155 : vector<4x32xf32>
    %157 = math.tanh %156 : vector<4x32xf32>
    %158 = arith.mulf %153, %157 : vector<4x32xf32>
    %159 = arith.addf %129, %158 : vector<4x32xf32>
    %160 = arith.maximumf %130, %158 : vector<4x32xf32>
    %161 = vector.extract_strided_slice %6 {offsets = [20, 0], sizes = [4, 128], strides = [1, 1]} : vector<32x128xf32> to vector<4x128xf32>
    %cst_31 = arith.constant dense<0.000000e+00> : vector<4x128xf32>
    %162 = tpu.matmul %158, %0, %cst_31 {dimension_numbers = #tpu.dot_dimension_numbers<[1], [0], [0], [1], [0, 0, 1, 1], [], []>} : vector<4x32xf32>, vector<32x128xf32>, vector<4x128xf32> -> vector<4x128xf32>
    %163 = arith.addf %161, %162 : vector<4x128xf32>
    %164 = vector.extract_strided_slice %163 {offsets = [0, 0], sizes = [4, 32], strides = [1, 1]} : vector<4x128xf32> to vector<4x32xf32>
    %165 = arith.negf %164 : vector<4x32xf32>
    %166 = math.exp %165 : vector<4x32xf32>
    %cst_32 = arith.constant 1.000000e+00 : f32
    %167 = vector.broadcast %cst_32 : f32 to vector<4x32xf32>
    %168 = arith.addf %167, %166 : vector<4x32xf32>
    %169 = arith.divf %167, %168 : vector<4x32xf32>
    %170 = vector.extract_strided_slice %163 {offsets = [0, 32], sizes = [4, 32], strides = [1, 1]} : vector<4x128xf32> to vector<4x32xf32>
    %171 = arith.negf %170 : vector<4x32xf32>
    %172 = math.exp %171 : vector<4x32xf32>
    %cst_33 = arith.constant 1.000000e+00 : f32
    %173 = vector.broadcast %cst_33 : f32 to vector<4x32xf32>
    %174 = arith.addf %173, %172 : vector<4x32xf32>
    %175 = arith.divf %173, %174 : vector<4x32xf32>
    %176 = vector.extract_strided_slice %163 {offsets = [0, 64], sizes = [4, 32], strides = [1, 1]} : vector<4x128xf32> to vector<4x32xf32>
    %177 = math.tanh %176 : vector<4x32xf32>
    %178 = vector.extract_strided_slice %163 {offsets = [0, 96], sizes = [4, 32], strides = [1, 1]} : vector<4x128xf32> to vector<4x32xf32>
    %179 = arith.negf %178 : vector<4x32xf32>
    %180 = math.exp %179 : vector<4x32xf32>
    %cst_34 = arith.constant 1.000000e+00 : f32
    %181 = vector.broadcast %cst_34 : f32 to vector<4x32xf32>
    %182 = arith.addf %181, %180 : vector<4x32xf32>
    %183 = arith.divf %181, %182 : vector<4x32xf32>
    %184 = arith.mulf %175, %156 : vector<4x32xf32>
    %185 = arith.mulf %169, %177 : vector<4x32xf32>
    %186 = arith.addf %184, %185 : vector<4x32xf32>
    %187 = math.tanh %186 : vector<4x32xf32>
    %188 = arith.mulf %183, %187 : vector<4x32xf32>
    %189 = arith.addf %159, %188 : vector<4x32xf32>
    %190 = arith.maximumf %160, %188 : vector<4x32xf32>
    %191 = vector.extract_strided_slice %6 {offsets = [24, 0], sizes = [4, 128], strides = [1, 1]} : vector<32x128xf32> to vector<4x128xf32>
    %cst_35 = arith.constant dense<0.000000e+00> : vector<4x128xf32>
    %192 = tpu.matmul %188, %0, %cst_35 {dimension_numbers = #tpu.dot_dimension_numbers<[1], [0], [0], [1], [0, 0, 1, 1], [], []>} : vector<4x32xf32>, vector<32x128xf32>, vector<4x128xf32> -> vector<4x128xf32>
    %193 = arith.addf %191, %192 : vector<4x128xf32>
    %194 = vector.extract_strided_slice %193 {offsets = [0, 0], sizes = [4, 32], strides = [1, 1]} : vector<4x128xf32> to vector<4x32xf32>
    %195 = arith.negf %194 : vector<4x32xf32>
    %196 = math.exp %195 : vector<4x32xf32>
    %cst_36 = arith.constant 1.000000e+00 : f32
    %197 = vector.broadcast %cst_36 : f32 to vector<4x32xf32>
    %198 = arith.addf %197, %196 : vector<4x32xf32>
    %199 = arith.divf %197, %198 : vector<4x32xf32>
    %200 = vector.extract_strided_slice %193 {offsets = [0, 32], sizes = [4, 32], strides = [1, 1]} : vector<4x128xf32> to vector<4x32xf32>
    %201 = arith.negf %200 : vector<4x32xf32>
    %202 = math.exp %201 : vector<4x32xf32>
    %cst_37 = arith.constant 1.000000e+00 : f32
    %203 = vector.broadcast %cst_37 : f32 to vector<4x32xf32>
    %204 = arith.addf %203, %202 : vector<4x32xf32>
    %205 = arith.divf %203, %204 : vector<4x32xf32>
    %206 = vector.extract_strided_slice %193 {offsets = [0, 64], sizes = [4, 32], strides = [1, 1]} : vector<4x128xf32> to vector<4x32xf32>
    %207 = math.tanh %206 : vector<4x32xf32>
    %208 = vector.extract_strided_slice %193 {offsets = [0, 96], sizes = [4, 32], strides = [1, 1]} : vector<4x128xf32> to vector<4x32xf32>
    %209 = arith.negf %208 : vector<4x32xf32>
    %210 = math.exp %209 : vector<4x32xf32>
    %cst_38 = arith.constant 1.000000e+00 : f32
    %211 = vector.broadcast %cst_38 : f32 to vector<4x32xf32>
    %212 = arith.addf %211, %210 : vector<4x32xf32>
    %213 = arith.divf %211, %212 : vector<4x32xf32>
    %214 = arith.mulf %205, %186 : vector<4x32xf32>
    %215 = arith.mulf %199, %207 : vector<4x32xf32>
    %216 = arith.addf %214, %215 : vector<4x32xf32>
    %217 = math.tanh %216 : vector<4x32xf32>
    %218 = arith.mulf %213, %217 : vector<4x32xf32>
    %219 = arith.addf %189, %218 : vector<4x32xf32>
    %220 = arith.maximumf %190, %218 : vector<4x32xf32>
    %221 = vector.extract_strided_slice %6 {offsets = [28, 0], sizes = [4, 128], strides = [1, 1]} : vector<32x128xf32> to vector<4x128xf32>
    %cst_39 = arith.constant dense<0.000000e+00> : vector<4x128xf32>
    %222 = tpu.matmul %218, %0, %cst_39 {dimension_numbers = #tpu.dot_dimension_numbers<[1], [0], [0], [1], [0, 0, 1, 1], [], []>} : vector<4x32xf32>, vector<32x128xf32>, vector<4x128xf32> -> vector<4x128xf32>
    %223 = arith.addf %221, %222 : vector<4x128xf32>
    %224 = vector.extract_strided_slice %223 {offsets = [0, 0], sizes = [4, 32], strides = [1, 1]} : vector<4x128xf32> to vector<4x32xf32>
    %225 = arith.negf %224 : vector<4x32xf32>
    %226 = math.exp %225 : vector<4x32xf32>
    %cst_40 = arith.constant 1.000000e+00 : f32
    %227 = vector.broadcast %cst_40 : f32 to vector<4x32xf32>
    %228 = arith.addf %227, %226 : vector<4x32xf32>
    %229 = arith.divf %227, %228 : vector<4x32xf32>
    %230 = vector.extract_strided_slice %223 {offsets = [0, 32], sizes = [4, 32], strides = [1, 1]} : vector<4x128xf32> to vector<4x32xf32>
    %231 = arith.negf %230 : vector<4x32xf32>
    %232 = math.exp %231 : vector<4x32xf32>
    %cst_41 = arith.constant 1.000000e+00 : f32
    %233 = vector.broadcast %cst_41 : f32 to vector<4x32xf32>
    %234 = arith.addf %233, %232 : vector<4x32xf32>
    %235 = arith.divf %233, %234 : vector<4x32xf32>
    %236 = vector.extract_strided_slice %223 {offsets = [0, 64], sizes = [4, 32], strides = [1, 1]} : vector<4x128xf32> to vector<4x32xf32>
    %237 = math.tanh %236 : vector<4x32xf32>
    %238 = vector.extract_strided_slice %223 {offsets = [0, 96], sizes = [4, 32], strides = [1, 1]} : vector<4x128xf32> to vector<4x32xf32>
    %239 = arith.negf %238 : vector<4x32xf32>
    %240 = math.exp %239 : vector<4x32xf32>
    %cst_42 = arith.constant 1.000000e+00 : f32
    %241 = vector.broadcast %cst_42 : f32 to vector<4x32xf32>
    %242 = arith.addf %241, %240 : vector<4x32xf32>
    %243 = arith.divf %241, %242 : vector<4x32xf32>
    %244 = arith.mulf %235, %216 : vector<4x32xf32>
    %245 = arith.mulf %229, %237 : vector<4x32xf32>
    %246 = arith.addf %244, %245 : vector<4x32xf32>
    %247 = math.tanh %246 : vector<4x32xf32>
    %248 = arith.mulf %243, %247 : vector<4x32xf32>
    %249 = arith.addf %219, %248 : vector<4x32xf32>
    %250 = arith.maximumf %220, %248 : vector<4x32xf32>
    %cst_43 = arith.constant 1.250000e-01 : f32
    %251 = vector.broadcast %cst_43 : f32 to vector<4x32xf32>
    %252 = arith.mulf %249, %251 : vector<4x32xf32>
    %253 = vector.extract_strided_slice %252 {offsets = [0, 0], sizes = [2, 32], strides = [1, 1]} : vector<4x32xf32> to vector<2x32xf32>
    %254 = vector.extract_strided_slice %252 {offsets = [2, 0], sizes = [2, 32], strides = [1, 1]} : vector<4x32xf32> to vector<2x32xf32>
    %255 = vector.extract_strided_slice %250 {offsets = [0, 0], sizes = [2, 32], strides = [1, 1]} : vector<4x32xf32> to vector<2x32xf32>
    %256 = vector.extract_strided_slice %250 {offsets = [2, 0], sizes = [2, 32], strides = [1, 1]} : vector<4x32xf32> to vector<2x32xf32>
    %257 = arith.subf %253, %254 : vector<2x32xf32>
    %258 = math.absf %257 : vector<2x32xf32>
    %259 = arith.subf %255, %256 : vector<2x32xf32>
    %260 = math.absf %259 : vector<2x32xf32>
    %261 = arith.mulf %253, %253 : vector<2x32xf32>
    %cst_44 = arith.constant dense<0.000000e+00> : vector<2xf32>
    %262 = vector.multi_reduction <add>, %261, %cst_44 [1] : vector<2x32xf32> to vector<2xf32>
    %263 = vector.shape_cast %262 : vector<2xf32> to vector<2x1xf32>
    %264 = arith.mulf %255, %255 : vector<2x32xf32>
    %cst_45 = arith.constant dense<0.000000e+00> : vector<2xf32>
    %265 = vector.multi_reduction <add>, %264, %cst_45 [1] : vector<2x32xf32> to vector<2xf32>
    %266 = vector.shape_cast %265 : vector<2xf32> to vector<2x1xf32>
    %267 = arith.addf %263, %266 : vector<2x1xf32>
    %268 = arith.mulf %254, %254 : vector<2x32xf32>
    %cst_46 = arith.constant dense<0.000000e+00> : vector<2xf32>
    %269 = vector.multi_reduction <add>, %268, %cst_46 [1] : vector<2x32xf32> to vector<2xf32>
    %270 = vector.shape_cast %269 : vector<2xf32> to vector<2x1xf32>
    %271 = arith.mulf %256, %256 : vector<2x32xf32>
    %cst_47 = arith.constant dense<0.000000e+00> : vector<2xf32>
    %272 = vector.multi_reduction <add>, %271, %cst_47 [1] : vector<2x32xf32> to vector<2xf32>
    %273 = vector.shape_cast %272 : vector<2xf32> to vector<2x1xf32>
    %274 = arith.addf %270, %273 : vector<2x1xf32>
    %cst_48 = arith.constant 9.99999996E-13 : f32
    %275 = vector.broadcast %cst_48 : f32 to vector<2x1xf32>
    %276 = arith.addf %267, %275 : vector<2x1xf32>
    %277 = math.rsqrt %276 : vector<2x1xf32>
    %cst_49 = arith.constant 9.99999996E-13 : f32
    %278 = vector.broadcast %cst_49 : f32 to vector<2x1xf32>
    %279 = arith.addf %274, %278 : vector<2x1xf32>
    %280 = math.rsqrt %279 : vector<2x1xf32>
    %281 = arith.mulf %277, %280 : vector<2x1xf32>
    %282 = arith.mulf %253, %254 : vector<2x32xf32>
    %283 = vector.broadcast %281 : vector<2x1xf32> to vector<2x32xf32>
    %284 = arith.mulf %282, %283 : vector<2x32xf32>
    %285 = arith.mulf %255, %256 : vector<2x32xf32>
    %286 = vector.broadcast %281 : vector<2x1xf32> to vector<2x32xf32>
    %287 = arith.mulf %285, %286 : vector<2x32xf32>
    %c0_50 = arith.constant 0 : index
    %c0_51 = arith.constant 0 : index
    %c0_52 = arith.constant 0 : index
    %288 = vector.load %arg4[%c0_50, %c0_51, %c0_52] : memref<4x32x64xf32, #tpu.memory_space<vmem>>, vector<1x32x64xf32>
    %289 = vector.shape_cast %288 : vector<1x32x64xf32> to vector<32x64xf32>
    %cst_53 = arith.constant dense<0.000000e+00> : vector<2x64xf32>
    %290 = tpu.matmul %258, %289, %cst_53 {dimension_numbers = #tpu.dot_dimension_numbers<[1], [0], [0], [1], [0, 0, 1, 1], [], []>} : vector<2x32xf32>, vector<32x64xf32>, vector<2x64xf32> -> vector<2x64xf32>
    %c1 = arith.constant 1 : index
    %c0_54 = arith.constant 0 : index
    %c0_55 = arith.constant 0 : index
    %291 = vector.load %arg4[%c1, %c0_54, %c0_55] : memref<4x32x64xf32, #tpu.memory_space<vmem>>, vector<1x32x64xf32>
    %292 = vector.shape_cast %291 : vector<1x32x64xf32> to vector<32x64xf32>
    %cst_56 = arith.constant dense<0.000000e+00> : vector<2x64xf32>
    %293 = tpu.matmul %260, %292, %cst_56 {dimension_numbers = #tpu.dot_dimension_numbers<[1], [0], [0], [1], [0, 0, 1, 1], [], []>} : vector<2x32xf32>, vector<32x64xf32>, vector<2x64xf32> -> vector<2x64xf32>
    %294 = arith.addf %290, %293 : vector<2x64xf32>
    %c2 = arith.constant 2 : index
    %c0_57 = arith.constant 0 : index
    %c0_58 = arith.constant 0 : index
    %295 = vector.load %arg4[%c2, %c0_57, %c0_58] : memref<4x32x64xf32, #tpu.memory_space<vmem>>, vector<1x32x64xf32>
    %296 = vector.shape_cast %295 : vector<1x32x64xf32> to vector<32x64xf32>
    %cst_59 = arith.constant dense<0.000000e+00> : vector<2x64xf32>
    %297 = tpu.matmul %284, %296, %cst_59 {dimension_numbers = #tpu.dot_dimension_numbers<[1], [0], [0], [1], [0, 0, 1, 1], [], []>} : vector<2x32xf32>, vector<32x64xf32>, vector<2x64xf32> -> vector<2x64xf32>
    %298 = arith.addf %294, %297 : vector<2x64xf32>
    %c3 = arith.constant 3 : index
    %c0_60 = arith.constant 0 : index
    %c0_61 = arith.constant 0 : index
    %299 = vector.load %arg4[%c3, %c0_60, %c0_61] : memref<4x32x64xf32, #tpu.memory_space<vmem>>, vector<1x32x64xf32>
    %300 = vector.shape_cast %299 : vector<1x32x64xf32> to vector<32x64xf32>
    %cst_62 = arith.constant dense<0.000000e+00> : vector<2x64xf32>
    %301 = tpu.matmul %287, %300, %cst_62 {dimension_numbers = #tpu.dot_dimension_numbers<[1], [0], [0], [1], [0, 0, 1, 1], [], []>} : vector<2x32xf32>, vector<32x64xf32>, vector<2x64xf32> -> vector<2x64xf32>
    %302 = arith.addf %298, %301 : vector<2x64xf32>
    %c0_63 = arith.constant 0 : index
    %c0_64 = arith.constant 0 : index
    %303 = vector.load %arg5[%c0_63, %c0_64] : memref<1x64xf32, #tpu.memory_space<vmem>>, vector<1x64xf32>
    %304 = vector.broadcast %303 : vector<1x64xf32> to vector<2x64xf32>
    %305 = arith.addf %302, %304 : vector<2x64xf32>
    %cst_65 = arith.constant 0.000000e+00 : f32
    %306 = vector.broadcast %cst_65 : f32 to vector<2x64xf32>
    %307 = arith.maximumf %305, %306 : vector<2x64xf32>
    %c0_66 = arith.constant 0 : index
    %c0_67 = arith.constant 0 : index
    %308 = vector.load %arg6[%c0_66, %c0_67] : memref<64x1xf32, #tpu.memory_space<vmem>>, vector<64x1xf32>
    %cst_68 = arith.constant dense<0.000000e+00> : vector<2x1xf32>
    %309 = tpu.matmul %307, %308, %cst_68 {dimension_numbers = #tpu.dot_dimension_numbers<[1], [0], [0], [1], [0, 0, 1, 1], [], []>} : vector<2x64xf32>, vector<64x1xf32>, vector<2x1xf32> -> vector<2x1xf32>
    %c0_69 = arith.constant 0 : index
    %c0_70 = arith.constant 0 : index
    %310 = vector.load %arg7[%c0_69, %c0_70] : memref<1x1xf32, #tpu.memory_space<vmem>>, vector<1x1xf32>
    %311 = vector.broadcast %310 : vector<1x1xf32> to vector<2x1xf32>
    %312 = arith.addf %309, %311 : vector<2x1xf32>
    %313 = arith.negf %312 : vector<2x1xf32>
    %314 = math.exp %313 : vector<2x1xf32>
    %cst_71 = arith.constant 1.000000e+00 : f32
    %315 = vector.broadcast %cst_71 : f32 to vector<2x1xf32>
    %316 = arith.addf %315, %314 : vector<2x1xf32>
    %317 = arith.divf %315, %316 : vector<2x1xf32>
    %c0_72 = arith.constant 0 : index
    %c0_73 = arith.constant 0 : index
    %318 = vector.load %arg8[%c0_72, %c0_73] : memref<2x1xf32, #tpu.memory_space<vmem>>, vector<2x1xf32>
    tpu.vector_store %arg8[%c0_72, %c0_73], %317 {strides = array<i32>} : memref<2x1xf32, #tpu.memory_space<vmem>>, vector<2x1xf32>,
    return
  }
}

</mosaic_0001>

<bundles_post_ra>
// kernel: tpu_custom_call.1
= control target key start
LH: loop header
LB: loop body
LE: loop exit
PB: predicated region body
PF: predicated region fallthrough
CT: control target
= control target key end

     0   :  { %s2309_s0 = inlined_call_operand.vmem [shape: f32[32,32], index: 0, kind: input, shape index: {}]   ;;  %s2310_s1 = inlined_call_operand.vmem [shape: f32[32,128], index: 1, kind: input, shape index: {}]   ;;  %s2311_s2 = inlined_call_operand.hbm [shape: f32[32,128], index: 2, kind: input, shape index: {}]   ;;  %s2312_s3 = inlined_call_operand.vmem [shape: f32[1,128], index: 3, kind: input, shape index: {}]   ;;  %s2313_s4 = inlined_call_operand.hbm [shape: f32[4,32,64], index: 4, kind: input, shape index: {}]   ;;  %s2314_s5 = inlined_call_operand.vmem [shape: f32[1,64], index: 5, kind: input, shape index: {}]   ;;  %s2315_s6 = inlined_call_operand.vmem [shape: f32[64,1], index: 6, kind: input, shape index: {}]   ;;  %s2316_s7 = inlined_call_operand.<no memory space> [shape: f32[1,1], index: 7, kind: input, shape index: {}]   ;;  %s2317_s8 = inlined_call_operand.vmem [shape: f32[2,1], index: 8, kind: output, shape index: {}]  }
   0x1   :  { %v13_v0 = vstv %s2316_s7 }
   0x2   :  { %14 = vst [vmem:[#allocation2] sm:$0x1] %v13_v0 }
   0x3   :  { %15 = vsyncpa [#allocation4], 0 }
   0x4   :  { %16 = vsyncpa [#allocation6], 0  ;;  %s2011_s29 = smov [#allocation3]   ;;  %s1963_s11 = scalar_lea.hbm %s2311_s2, 512 }
   0x5   :  { %s26_s30 = sshll.u32 %s2011_s29, 4  ;;  %p1964_p0 = scmp.ne.s32.totalorder %s2311_s2, %s1963_s11  ;;  %s27_s30 = int_to_ptr.vmem [resolvable:$true] %s26_s30 }
   0x6   :  { %p1967_p1 = scmp.lt.u32.totalorder %s1963_s11, %s2311_s2 }
   0x8   :  { %p1969_p2 = pnand %p1967_p1, %p1964_p0 }
   0xa   :  { %1972 = shalt.err (!%p1969_p2)
}
   0xb   :  { %s1973_s7 = scalar_lea.vmem %s27_s30, 512  ;;  %p1978_p4 = scmp.lt.s32.totalorder %s27_s30, %s27_s30 }
   0xc   :  { %p1974_p3 = scmp.ne.s32.totalorder %s27_s30, %s1973_s7  ;;  %p1979_p5 = scmp.lt.s32.totalorder %s1973_s7, %s1973_s7 }
   0xe   :  { %p1980_p6 = por %p1979_p5, %p1978_p4 }
  0x10   :  { %p1981_p7 = pnand %p1980_p6, %p1974_p3 }
  0x12   :  { %1984 = shalt.err (!%p1981_p7)
}
  0x13   :  { %s2012_s16 = smov 128   ;;  %s2013_s17 = smov 8  }
  0x14   :  { %32 = dma.hbm_to_vmem [thread:$0]  %s2311_s2, 512, %s27_s30, [#allocation4], %s2012_s16, %s2012_s16, %s2013_s17  }
  0x15   :  { %s2014_s20 = smov [#allocation5]   ;;  %s1985_s24 = scalar_lea.hbm %s2313_s4, 2048 }
  0x16   :  { %s40_s21 = sshll.u32 %s2014_s20, 4  ;;  %p1986_p8 = scmp.ne.s32.totalorder %s2313_s4, %s1985_s24  ;;  %s41_s21 = int_to_ptr.vmem [resolvable:$true] %s40_s21 }
  0x17   :  { %p1989_p9 = scmp.lt.u32.totalorder %s1985_s24, %s2313_s4 }
  0x19   :  { %p1991_p10 = pnand %p1989_p9, %p1986_p8 }
  0x1b   :  { %1994 = shalt.err (!%p1991_p10)
}
  0x1c   :  { %s1995_s29 = scalar_lea.vmem %s41_s21, 2048  ;;  %p2000_p12 = scmp.lt.s32.totalorder %s41_s21, %s41_s21 }
  0x1d   :  { %p1996_p11 = scmp.ne.s32.totalorder %s41_s21, %s1995_s29  ;;  %p2001_p13 = scmp.lt.s32.totalorder %s1995_s29, %s1995_s29 }
  0x1f   :  { %p2002_p0 = por %p2001_p13, %p2000_p12 }
  0x21   :  { %p2003_p1 = pnand %p2002_p0, %p1996_p11 }
  0x23   :  { %2006 = shalt.err (!%p2003_p1)
}
  0x24   :  { %46 = dma.hbm_to_vmem [thread:$0]  %s2313_s4, 2048, %s41_s21, [#allocation6], %s2012_s16, %s2012_s16, %s2013_s17  }
  0x25   :  { %2007 = dma.done.wait [#allocation4], 512  }
  0x26   :  { %2008 = vsyncadd [#allocation4], 4294966784 }
  0x27   :  { %2009 = dma.done.wait [#allocation6], 2048  }
  0x28   :  { %2010 = vsyncadd [#allocation6], 4294965248  ;;  %v2015_v1 = vmov 0.0|0.0   ;;  %vm2016_vm0 = vmmov 0   ;;  %v2017_v2 = vmov 0.0   ;;  %v67_v3 = vld [vmem:[%s2310_s1] sm:$0xff] }
  0x29   :  { %1796 = vmatprep.subr.bf16.mxu1 %v2015_v1  ;;  %1645 = vmatprep.mubr.msk.f32.mxu1 %vm2016_vm0, %v2017_v2  ;;  %v68_v4 = vld [vmem:[%s2310_s1 + $0x8] sm:$0xff]  ;;  %vm78_vm1 = vcmask 261120   ;;  %v69_v8 = vld [vmem:[%s2310_s1 + $0x10] sm:$0xff]  ;;  %v70_v9 = vld [vmem:[%s2310_s1 + $0x18] sm:$0xff]  ;;  %s2018_s20 = smov 64   ;;  %vm1060_vm2 = vcmask 257026  }
  0x2a   :  { %v59_v5 = vld [vmem:[#allocation3] sm:$0xff]  ;;  %v1788_v6 = vpack.c.bf16 %v68_v4, %v67_v3  ;;  %v60_v7 = vld [vmem:[#allocation3 + $0x8] sm:$0xff]  ;;  %v1792_v11 = vpack.c.bf16 %v70_v9, %v69_v8  ;;  %v61_v13 = vld [vmem:[#allocation3 + $0x10] sm:$0xff]  ;;  %vm1047_vm3 = vcmask 254976   ;;  %vm1430_vm4 = vcmask 523264  }
  0x2b   :  { %v2108_v10 = vpack.c.bf16 %v60_v7, %v59_v5  ;;  %v63_v12 = vld [vmem:[%s2309_s0] sm:$0xff]  ;;  %v64_v16 = vld [vmem:[%s2309_s0 + $0x8] sm:$0xff]  ;;  %v65_v34 = vld [vmem:[%s2309_s0 + $0x10] sm:$0xff]  ;;  %vm1510_vm5 = vcmask 1024  }
  0x2c   :  { %v62_v14 = vld [vmem:[#allocation3 + $0x18] sm:$0xff]  ;;  %1789 = vmatprep.subr.bf16.mxu0 %v1788_v6  ;;  %1631 = vmatprep.mubr.msk.f32.mxu0 %vm78_vm1, %v63_v12 }
  0x2d   :  { %1791 = vmatpush3.bf16.msra.mxu0 %v1788_v6  ;;  %1798 = vmatpush3.bf16.msra.mxu1 %v2108_v10  ;;  %v2115_v15 = vpack.c.bf16 %v62_v14, %v61_v13  ;;  %v2139_v17 = vld [vmem:[%s2312_s3] ss:$0 sm:$0xff]  ;;  %s2019_s3 = smov 32   ;;  %v66_v35 = vld [vmem:[%s2309_s0 + $0x18] sm:$0xff] }
  0x2e   :  { %1793 = vmatprep.subr.bf16.mxu0 %v1792_v11  ;;  %1799 = vmatprep.subr.bf16.mxu1 %v2015_v1 }
  0x31   :  { %1795 = vmatpush3.bf16.msra.mxu0 %v1792_v11  ;;  %1801 = vmatpush3.bf16.msra.mxu1 %v2115_v15 }
  0x32   :  { %1802 = vmatprep.subr.bf16.mxu0 %v2015_v1  ;;  %1808 = vmatprep.subr.bf16.mxu1 %v2015_v1 }
  0x34   :  { %1632 = vmatmul.mubr.msk.f32.vlgmr.msra.gmra.mrb[0].mxu0 %vm78_vm1, %v64_v16  ;;  %1646 = vmatmul.mubr.f32.vlgmr.msra.gmra.mrb[0].mxu1 %v2017_v2 }
  0x35   :  { %1804 = vmatpush3.bf16.msra.mxu0 %v2108_v10  ;;  %1810 = vmatpush3.bf16.msra.mxu1 %v2108_v10 }
  0x36   :  { %1805 = vmatprep.subr.bf16.mxu0 %v2015_v1  ;;  %1811 = vmatprep.subr.bf16.mxu1 %v2015_v1 }
  0x37   :  { %1667 = vmatprep.mubr.msk.f32.mxu1 %vm2016_vm0, %v2017_v2  ;;  %1634 = vmatprep.mubr.msk.f32.mxu0 %vm78_vm1, %v65_v34 }
  0x38   :  { %1635 = vmatmul.mubr.msk.f32.gmra.mrb[2].mxu0 %vm78_vm1, %v66_v35 }
  0x39   :  { %1807 = vmatpush3.bf16.msra.mxu0 %v2115_v15  ;;  %1813 = vmatpush3.bf16.msra.mxu1 %v2115_v15 }
  0x3a   :  { %1814 = vmatprep.subr.bf16.mxu0 %v2015_v1  ;;  %1820 = vmatprep.subr.bf16.mxu1 %v2015_v1 }
  0x3b   :  { %1656 = vmatprep.mubr.msk.f32.mxu0 %vm2016_vm0, %v2017_v2 }
 0x107   :  { %v2141_v18 = vpop.f32.mrb[0].mxu0  ;;  %v245_v19 = vpop.f32.mrb[0].mxu1 }
 0x108   :  { %v157_v20 = vpop.f32.mrb[1].mxu0  ;;  %v1647_v21 = vpop.f32.mrb[1].mxu1  ;;  %v163_v62 = vadd.f32 %v2141_v18, %v2139_v17 }
 0x109   :  { %v158_v22 = vadd.f32 %v2139_v17, %v157_v20 }
 0x10b   :  { %v249_v23 = vadd.f32 %v245_v19, %v158_v22  ;;  %v2161_v39 = vpop.f32.mrb[2].mxu0 }
 0x10c   :  { %v2163_v40 = vpop.f32.mrb[3].mxu0 }
 0x10d   :  { %1891 = vtanh.f32 %v249_v23  ;;  %v1523_v25 = vmul.f32 -1.442695, %v249_v23 }
 0x10f   :  { %1893 = vpow2.f32 %v1523_v25 }
 0x117   :  { %v1892_v24 = vpop.eup %1891 }
 0x118   :  { %259 = vrot.lane.b32.xlu0 %v1892_v24, %s2018_s20 }
 0x119   :  { %v1894_v26 = vpop.eup %1893 }
 0x11a   :  { %v253_v27 = vadd.f32 1.0, %v1894_v26 }
 0x11c   :  { %1895 = vrcp.f32 %v253_v27 }
 0x126   :  { %v1896_v28 = vpop.eup %1895 }
 0x127   :  { %v257_v31 = vmul.f32 0.0, %v1896_v28 }
 0x18a   :  { %v260_v29 = vpop.permute.xlu0 %259 }
 0x18b   :  { %v262_v30 = vmul.f32 %v1896_v28, %v260_v29 }
 0x18d   :  { %264 = vrot.lane.b32.xlu0 %v262_v30, %s2019_s3 }
 0x1ff   :  { %v265_v32 = vpop.permute.xlu0 %264 }
 0x200   :  { %v267_v33 = vadd.f32 %v265_v32, %v257_v31 }
 0x202   :  { %1897 = vtanh.f32 %v267_v33  ;;  %v362_v53 = vrot.slane %v267_v33, 4 }
 0x20c   :  { %v1898_v36 = vpop.eup %1897 }
 0x20d   :  { %270 = vrot.lane.b32.xlu1 %v1898_v36, %s2018_s20 }
 0x27f   :  { %v271_v37 = vpop.permute.xlu1 %270 }
 0x280   :  { %v2157_v38 = vmul.f32 %v1896_v28, %v271_v37 }
 0x282   :  { %276 = vrot.lane.b32.xlu1 %v2157_v38, %s2019_s3 }
 0x2f4   :  { %v277_v41 = vpop.permute.xlu1 %276 }
 0x2f5   :  { %1657 = vmatmul.mubr.msk.f32.vlgmr.msra.gmra.mrb[4].mxu0 %vm78_vm1, %v277_v41 }
 0x2f6   :  { %1816 = vmatpush3.bf16.msra.mxu0 %v2108_v10  ;;  %1678 = vmatprep.mubr.msk.f32.mxu0 %vm2016_vm0, %v2017_v2 }
 0x2f7   :  { %1817 = vmatprep.subr.bf16.mxu0 %v2015_v1 }
 0x2fa   :  { %1819 = vmatpush3.bf16.msra.mxu0 %v2115_v15 }
 0x2fb   :  { %1826 = vmatprep.subr.bf16.mxu0 %v2015_v1 }
 0x3c8   :  { %v346_v42 = vpop.f32.mrb[4].mxu0 }
 0x3c9   :  { %v351_v43 = vrot.slane %v346_v42, 4  ;;  %v1658_v44 = vpop.f32.mrb[5].mxu0 }
 0x3cb   :  { %v353_v45 = vadd.f32 %v351_v43, %v158_v22 }
 0x3cd   :  { %1899 = vtanh.f32 %v353_v45  ;;  %v1525_v47 = vmul.f32 -1.442695, %v353_v45 }
 0x3cf   :  { %1901 = vpow2.f32 %v1525_v47 }
 0x3d7   :  { %v1900_v46 = vpop.eup %1899 }
 0x3d8   :  { %366 = vrot.lane.b32.xlu0 %v1900_v46, %s2018_s20 }
 0x3d9   :  { %v1902_v48 = vpop.eup %1901 }
 0x3da   :  { %v357_v49 = vadd.f32 1.0, %v1902_v48 }
 0x3dc   :  { %1903 = vrcp.f32 %v357_v49 }
 0x3e6   :  { %v1904_v50 = vpop.eup %1903 }
 0x3e7   :  { %v364_v54 = vmul.f32 %v1904_v50, %v362_v53 }
 0x44a   :  { %v367_v51 = vpop.permute.xlu0 %366 }
 0x44b   :  { %v369_v52 = vmul.f32 %v1904_v50, %v367_v51 }
 0x44d   :  { %371 = vrot.lane.b32.xlu1 %v369_v52, %s2019_s3 }
 0x4bf   :  { %v372_v55 = vpop.permute.xlu1 %371 }
 0x4c0   :  { %v374_v56 = vadd.f32 %v372_v55, %v364_v54 }
 0x4c2   :  { %1905 = vtanh.f32 %v374_v56  ;;  %v469_v12 = vrot.slane %v374_v56, 4 }
 0x4cc   :  { %v1906_v57 = vpop.eup %1905 }
 0x4cd   :  { %377 = vrot.lane.b32.xlu0 %v1906_v57, %s2018_s20 }
 0x53f   :  { %v378_v58 = vpop.permute.xlu0 %377 }
 0x540   :  { %v380_v59 = vmul.f32 %v1904_v50, %v378_v58  ;;  %v168_v50 = vadd.f32 %v2139_v17, %v2163_v40 }
 0x542   :  { %v382_v60 = vrot.slane %v380_v59, 4 }
 0x544   :  { %386 = vrot.lane.b32.xlu1 %v382_v60, %s2019_s3  ;;  %v384_v20 = vadd.f32 %v382_v60, %v2157_v38  ;;  %v385_v21 = vmax.f32 %v2157_v38, %v382_v60 }
 0x5b6   :  { %v387_v61 = vpop.permute.xlu1 %386 }
 0x5b7   :  { %1668 = vmatmul.mubr.msk.f32.vlgmr.msra.gmra.mrb[2].mxu1 %vm78_vm1, %v387_v61 }
 0x5b8   :  { %1822 = vmatpush3.bf16.msra.mxu1 %v2108_v10  ;;  %1689 = vmatprep.mubr.msk.f32.mxu1 %vm2016_vm0, %v2017_v2 }
 0x5b9   :  { %1823 = vmatprep.subr.bf16.mxu1 %v2015_v1 }
 0x5bc   :  { %1825 = vmatpush3.bf16.msra.mxu1 %v2115_v15 }
 0x5bd   :  { %1832 = vmatprep.subr.bf16.mxu1 %v2015_v1 }
 0x68a   :  { %v456_v63 = vpop.f32.mrb[2].mxu1 }
 0x68b   :  { %v460_v0 = vadd.f32 %v456_v63, %v163_v62  ;;  %v1669_v3 = vpop.f32.mrb[3].mxu1 }
 0x68d   :  { %1907 = vtanh.f32 %v460_v0  ;;  %v1527_v5 = vmul.f32 -1.442695, %v460_v0 }
 0x68f   :  { %1909 = vpow2.f32 %v1527_v5 }
 0x697   :  { %v1908_v4 = vpop.eup %1907 }
 0x698   :  { %473 = vrot.lane.b32.xlu0 %v1908_v4, %s2018_s20 }
 0x699   :  { %v1910_v6 = vpop.eup %1909 }
 0x69a   :  { %v464_v7 = vadd.f32 1.0, %v1910_v6 }
 0x69c   :  { %1911 = vrcp.f32 %v464_v7 }
 0x6a6   :  { %v1912_v8 = vpop.eup %1911 }
 0x6a7   :  { %v471_v13 = vmul.f32 %v1912_v8, %v469_v12 }
 0x70a   :  { %v474_v9 = vpop.permute.xlu0 %473 }
 0x70b   :  { %v476_v11 = vmul.f32 %v1912_v8, %v474_v9 }
 0x70d   :  { %478 = vrot.lane.b32.xlu1 %v476_v11, %s2019_s3 }
 0x77f   :  { %v479_v14 = vpop.permute.xlu1 %478 }
 0x780   :  { %v481_v16 = vadd.f32 %v479_v14, %v471_v13 }
 0x782   :  { %1913 = vtanh.f32 %v481_v16  ;;  %v577_v37 = vrot.slane %v481_v16, 4 }
 0x78c   :  { %v1914_v18 = vpop.eup %1913 }
 0x78d   :  { %484 = vrot.lane.b32.xlu0 %v1914_v18, %s2018_s20 }
 0x7ff   :  { %v485_v19 = vpop.permute.xlu0 %484 }
 0x800   :  { %v487_v22 = vmul.f32 %v1912_v8, %v485_v19 }
 0x802   :  { %v488_v23 = vadd.f32 %v487_v22, %v384_v20  ;;  %v2190_v24 = vmax.f32 %v385_v21, %v487_v22  ;;  %491 = vrot.lane.b32.xlu1 %v487_v22, %s2019_s3 }
 0x874   :  { %v492_v25 = vpop.permute.xlu1 %491 }
 0x875   :  { %1679 = vmatmul.mubr.msk.f32.vlgmr.msra.gmra.mrb[6].mxu0 %vm78_vm1, %v492_v25 }
 0x876   :  { %1828 = vmatpush3.bf16.msra.mxu0 %v2108_v10  ;;  %1700 = vmatprep.mubr.msk.f32.mxu0 %vm2016_vm0, %v2017_v2 }
 0x877   :  { %1829 = vmatprep.subr.bf16.mxu0 %v2015_v1 }
 0x87a   :  { %1831 = vmatpush3.bf16.msra.mxu0 %v2115_v15 }
 0x87b   :  { %1838 = vmatprep.subr.bf16.mxu0 %v2015_v1 }
 0x948   :  { %v561_v26 = vpop.f32.mrb[6].mxu0 }
 0x949   :  { %v566_v27 = vrot.slane %v561_v26, 4  ;;  %v1680_v28 = vpop.f32.mrb[7].mxu0 }
 0x94b   :  { %v568_v29 = vadd.f32 %v566_v27, %v163_v62 }
 0x94d   :  { %1915 = vtanh.f32 %v568_v29  ;;  %v1529_v31 = vmul.f32 -1.442695, %v568_v29 }
 0x94f   :  { %1917 = vpow2.f32 %v1529_v31  ;;  %v173_v31 = vadd.f32 %v2161_v39, %v2139_v17 }
 0x957   :  { %v1916_v30 = vpop.eup %1915 }
 0x958   :  { %581 = vrot.lane.b32.xlu0 %v1916_v30, %s2018_s20 }
 0x959   :  { %v1918_v32 = vpop.eup %1917 }
 0x95a   :  { %v572_v33 = vadd.f32 1.0, %v1918_v32 }
 0x95c   :  { %1919 = vrcp.f32 %v572_v33 }
 0x966   :  { %v1920_v34 = vpop.eup %1919 }
 0x967   :  { %v579_v38 = vmul.f32 %v1920_v34, %v577_v37 }
 0x9ca   :  { %v582_v35 = vpop.permute.xlu0 %581 }
 0x9cb   :  { %v584_v36 = vmul.f32 %v1920_v34, %v582_v35 }
 0x9cd   :  { %586 = vrot.lane.b32.xlu1 %v584_v36, %s2019_s3 }
 0xa3f   :  { %v587_v41 = vpop.permute.xlu1 %586 }
 0xa40   :  { %v589_v42 = vadd.f32 %v587_v41, %v579_v38 }
 0xa42   :  { %1921 = vtanh.f32 %v589_v42  ;;  %v684_v61 = vrot.slane %v589_v42, 4 }
 0xa4c   :  { %v1922_v43 = vpop.eup %1921 }
 0xa4d   :  { %592 = vrot.lane.b32.xlu0 %v1922_v43, %s2018_s20 }
 0xabf   :  { %v593_v44 = vpop.permute.xlu0 %592 }
 0xac0   :  { %v595_v45 = vmul.f32 %v1920_v34, %v593_v44 }
 0xac2   :  { %v597_v46 = vrot.slane %v595_v45, 4 }
 0xac4   :  { %v599_v47 = vadd.f32 %v597_v46, %v488_v23  ;;  %v600_v48 = vmax.f32 %v2190_v24, %v597_v46  ;;  %601 = vrot.lane.b32.xlu1 %v597_v46, %s2019_s3 }
 0xb36   :  { %v602_v49 = vpop.permute.xlu1 %601 }
 0xb37   :  { %1690 = vmatmul.mubr.msk.f32.vlgmr.msra.gmra.mrb[4].mxu1 %vm78_vm1, %v602_v49 }
 0xb38   :  { %1834 = vmatpush3.bf16.msra.mxu1 %v2108_v10  ;;  %1711 = vmatprep.mubr.msk.f32.mxu1 %vm2016_vm0, %v2017_v2 }
 0xb39   :  { %1835 = vmatprep.subr.bf16.mxu1 %v2015_v1 }
 0xb3c   :  { %1837 = vmatpush3.bf16.msra.mxu1 %v2115_v15 }
 0xb3d   :  { %1844 = vmatprep.subr.bf16.mxu1 %v2015_v1 }
 0xc0a   :  { %v671_v51 = vpop.f32.mrb[4].mxu1 }
 0xc0b   :  { %v675_v52 = vadd.f32 %v671_v51, %v168_v50  ;;  %v1691_v53 = vpop.f32.mrb[5].mxu1 }
 0xc0d   :  { %1923 = vtanh.f32 %v675_v52  ;;  %v1531_v55 = vmul.f32 -1.442695, %v675_v52 }
 0xc0f   :  { %1925 = vpow2.f32 %v1531_v55 }
 0xc17   :  { %v1924_v54 = vpop.eup %1923 }
 0xc18   :  { %688 = vrot.lane.b32.xlu0 %v1924_v54, %s2018_s20 }
 0xc19   :  { %v1926_v56 = vpop.eup %1925 }
 0xc1a   :  { %v679_v57 = vadd.f32 1.0, %v1926_v56 }
 0xc1c   :  { %1927 = vrcp.f32 %v679_v57 }
 0xc26   :  { %v1928_v58 = vpop.eup %1927 }
 0xc27   :  { %v686_v62 = vmul.f32 %v1928_v58, %v684_v61 }
 0xc8a   :  { %v689_v59 = vpop.permute.xlu0 %688 }
 0xc8b   :  { %v691_v60 = vmul.f32 %v1928_v58, %v689_v59 }
 0xc8d   :  { %693 = vrot.lane.b32.xlu1 %v691_v60, %s2019_s3 }
 0xcff   :  { %v694_v40 = vpop.permute.xlu1 %693 }
 0xd00   :  { %v696_v63 = vadd.f32 %v694_v40, %v686_v62 }
 0xd02   :  { %1929 = vtanh.f32 %v696_v63 }
 0xd0c   :  { %v1930_v0 = vpop.eup %1929 }
 0xd0d   :  { %699 = vrot.lane.b32.xlu0 %v1930_v0, %s2018_s20 }
 0xd7f   :  { %v700_v3 = vpop.permute.xlu0 %699 }
 0xd80   :  { %v702_v4 = vmul.f32 %v1928_v58, %v700_v3 }
 0xd82   :  { %v703_v5 = vadd.f32 %v702_v4, %v599_v47  ;;  %v2217_v6 = vmax.f32 %v600_v48, %v702_v4  ;;  %706 = vrot.lane.b32.xlu1 %v702_v4, %s2019_s3 }
 0xdf4   :  { %v707_v7 = vpop.permute.xlu1 %706 }
 0xdf5   :  { %1701 = vmatmul.mubr.msk.f32.vlgmr.msra.gmra.mrb[8].mxu0 %vm78_vm1, %v707_v7 }
 0xdf6   :  { %1840 = vmatpush3.bf16.msra.mxu0 %v2108_v10  ;;  %1722 = vmatprep.mubr.msk.f32.mxu0 %vm2016_vm0, %v2017_v2 }
 0xdf7   :  { %1841 = vmatprep.subr.bf16.mxu0 %v2015_v1 }
 0xdfa   :  { %1843 = vmatpush3.bf16.msra.mxu0 %v2115_v15  ;;  %v792_v15 = vrot.slane %v696_v63, 4 }
 0xdfb   :  { %1850 = vmatprep.subr.bf16.mxu0 %v2015_v1 }
 0xec8   :  { %v776_v8 = vpop.f32.mrb[8].mxu0 }
 0xec9   :  { %v781_v9 = vrot.slane %v776_v8, 4  ;;  %v1702_v11 = vpop.f32.mrb[9].mxu0 }
 0xecb   :  { %v783_v12 = vadd.f32 %v781_v9, %v168_v50 }
 0xecd   :  { %1931 = vtanh.f32 %v783_v12  ;;  %v1533_v14 = vmul.f32 -1.442695, %v783_v12 }
 0xecf   :  { %1933 = vpow2.f32 %v1533_v14 }
 0xed7   :  { %v1932_v13 = vpop.eup %1931 }
 0xed8   :  { %796 = vrot.lane.b32.xlu0 %v1932_v13, %s2018_s20 }
 0xed9   :  { %v1934_v10 = vpop.eup %1933 }
 0xeda   :  { %v787_v16 = vadd.f32 1.0, %v1934_v10 }
 0xedc   :  { %1935 = vrcp.f32 %v787_v16 }
 0xee6   :  { %v1936_v18 = vpop.eup %1935 }
 0xee7   :  { %v794_v21 = vmul.f32 %v1936_v18, %v792_v15 }
 0xf4a   :  { %v797_v19 = vpop.permute.xlu0 %796 }
 0xf4b   :  { %v799_v20 = vmul.f32 %v1936_v18, %v797_v19 }
 0xf4d   :  { %801 = vrot.lane.b32.xlu1 %v799_v20, %s2019_s3 }
 0xfbf   :  { %v802_v22 = vpop.permute.xlu1 %801 }
 0xfc0   :  { %v804_v23 = vadd.f32 %v802_v22, %v794_v21 }
 0xfc2   :  { %1937 = vtanh.f32 %v804_v23  ;;  %v899_v44 = vrot.slane %v804_v23, 4 }
 0xfcc   :  { %v1938_v24 = vpop.eup %1937 }
 0xfcd   :  { %807 = vrot.lane.b32.xlu0 %v1938_v24, %s2018_s20  ;;  %v1090_v24 = vld [vmem:[#allocation5 + $0x20] sm:$0xff] }
0x103f   :  { %v808_v25 = vpop.permute.xlu0 %807 }
0x1040   :  { %v810_v26 = vmul.f32 %v1936_v18, %v808_v25  ;;  %v1091_v25 = vld [vmem:[#allocation5 + $0x28] sm:$0xff] }
0x1042   :  { %v812_v27 = vrot.slane %v810_v26, 4  ;;  %v1845_v26 = vpack.c.bf16 %v1091_v25, %v1090_v24  ;;  %v1422_v24 = vld [vmem:[%s2315_s6 + $0x38] sm:$0xff] }
0x1044   :  { %v814_v28 = vadd.f32 %v812_v27, %v703_v5  ;;  %v815_v29 = vmax.f32 %v2217_v6, %v812_v27  ;;  %816 = vrot.lane.b32.xlu1 %v812_v27, %s2019_s3 }
0x10b6   :  { %v817_v30 = vpop.permute.xlu1 %816 }
0x10b7   :  { %1712 = vmatmul.mubr.msk.f32.vlgmr.msra.gmra.mrb[6].mxu1 %vm78_vm1, %v817_v30  ;;  %v1085_v30 = vld [vmem:[#allocation5] sm:$0xff] }
0x10b8   :  { %1733 = vmatprep.mubr.msk.f32.mxu1 %vm2016_vm0, %v2017_v2  ;;  %1846 = vmatpush3.bf16.msra.mxu1 %v1845_v26 }
0x10b9   :  { %1847 = vmatprep.subr.bf16.mxu1 %v2015_v1 }
0x118a   :  { %v886_v32 = vpop.f32.mrb[6].mxu1 }
0x118b   :  { %v890_v33 = vadd.f32 %v886_v32, %v173_v31  ;;  %v1713_v34 = vpop.f32.mrb[7].mxu1  ;;  %v1086_v32 = vld [vmem:[#allocation5 + $0x8] sm:$0xff] }
0x118d   :  { %1939 = vtanh.f32 %v890_v33  ;;  %v1535_v36 = vmul.f32 -1.442695, %v890_v33  ;;  %v1851_v33 = vpack.c.bf16 %v1086_v32, %v1085_v30  ;;  %v1542_v30 = vld [vmem:[%s2314_s5] ss:$0 sm:$0xff] }
0x118f   :  { %1941 = vpow2.f32 %v1535_v36  ;;  %v1087_v36 = vld [vmem:[#allocation5 + $0x10] sm:$0xff] }
0x1197   :  { %v1940_v35 = vpop.eup %1939 }
0x1198   :  { %903 = vrot.lane.b32.xlu0 %v1940_v35, %s2018_s20 }
0x1199   :  { %v1942_v37 = vpop.eup %1941 }
0x119a   :  { %v894_v38 = vadd.f32 1.0, %v1942_v37  ;;  %v1088_v37 = vld [vmem:[#allocation5 + $0x18] sm:$0xff] }
0x119c   :  { %1943 = vrcp.f32 %v894_v38  ;;  %v1854_v38 = vpack.c.bf16 %v1088_v37, %v1087_v36 }
0x11a6   :  { %v1944_v41 = vpop.eup %1943 }
0x11a7   :  { %v901_v45 = vmul.f32 %v1944_v41, %v899_v44 }
0x120a   :  { %v904_v42 = vpop.permute.xlu0 %903 }
0x120b   :  { %v906_v43 = vmul.f32 %v1944_v41, %v904_v42  ;;  %v2020_v42 = vmov 0  }
0x120c   :  { %1890 = vset.pattern.permute.xlu0 %v2020_v42 }
0x120d   :  { %908 = vrot.lane.b32.xlu1 %v906_v43, %s2019_s3 }
0x127f   :  { %v909_v17 = vpop.permute.xlu1 %908 }
0x1280   :  { %v911_v39 = vadd.f32 %v909_v17, %v901_v45 }
0x1282   :  { %1945 = vtanh.f32 %v911_v39  ;;  %v1007_v40 = vrot.slane %v911_v39, 4 }
0x128c   :  { %v1946_v46 = vpop.eup %1945 }
0x128d   :  { %914 = vrot.lane.b32.xlu0 %v1946_v46, %s2018_s20 }
0x12ff   :  { %v915_v47 = vpop.permute.xlu0 %914 }
0x1300   :  { %v917_v48 = vmul.f32 %v1944_v41, %v915_v47 }
0x1302   :  { %921 = vrot.lane.b32.xlu1 %v917_v48, %s2019_s3  ;;  %v918_v49 = vadd.f32 %v917_v48, %v814_v28  ;;  %v919_v50 = vmax.f32 %v815_v29, %v917_v48  ;;  %v1092_v28 = vld [vmem:[#allocation5 + $0x30] sm:$0xff]  ;;  %v1093_v29 = vld [vmem:[#allocation5 + $0x38] sm:$0xff] }
0x1374   :  { %v922_v51 = vpop.permute.xlu1 %921 }
0x1375   :  { %1723 = vmatmul.mubr.msk.f32.vlgmr.msra.gmra.mrb[10].mxu0 %vm78_vm1, %v922_v51 }
0x1376   :  { %1744 = vmatprep.mubr.msk.f32.mxu0 %vm2016_vm0, %v2017_v2  ;;  %1852 = vmatpush3.bf16.msra.mxu0 %v1851_v33 }
0x1377   :  { %1853 = vmatprep.subr.bf16.mxu0 %v2015_v1 }
0x137a   :  { %1855 = vmatpush3.bf16.msra.mxu0 %v1854_v38 }
0x137b   :  { %1862 = vmatprep.subr.bf16.mxu0 %v2015_v1 }
0x1448   :  { %v991_v52 = vpop.f32.mrb[10].mxu0 }
0x1449   :  { %v996_v53 = vrot.slane %v991_v52, 4  ;;  %v1724_v54 = vpop.f32.mrb[11].mxu0 }
0x144b   :  { %v998_v55 = vadd.f32 %v996_v53, %v173_v31  ;;  %v1848_v31 = vpack.c.bf16 %v1093_v29, %v1092_v28 }
0x144d   :  { %1947 = vtanh.f32 %v998_v55  ;;  %v1537_v57 = vmul.f32 -1.442695, %v998_v55  ;;  %1849 = vmatpush3.bf16.msra.mxu1 %v1848_v31  ;;  %v1245_v55 = vld [vmem:[#allocation5 + $0x40] sm:$0xff] }
0x144e   :  { %1856 = vmatprep.subr.bf16.mxu1 %v2015_v1 }
0x144f   :  { %1949 = vpow2.f32 %v1537_v57  ;;  %v1247_v57 = vld [vmem:[#allocation5 + $0x50] sm:$0xff] }
0x1457   :  { %v1948_v56 = vpop.eup %1947 }
0x1458   :  { %1011 = vrot.lane.b32.xlu0 %v1948_v56, %s2018_s20  ;;  %v1246_v56 = vld [vmem:[#allocation5 + $0x48] sm:$0xff] }
0x1459   :  { %v1950_v58 = vpop.eup %1949 }
0x145a   :  { %v1002_v59 = vadd.f32 1.0, %v1950_v58  ;;  %v1857_v58 = vpack.c.bf16 %v1246_v56, %v1245_v55 }
0x145c   :  { %1951 = vrcp.f32 %v1002_v59  ;;  %v1248_v59 = vld [vmem:[#allocation5 + $0x58] sm:$0xff] }
0x1466   :  { %v1952_v60 = vpop.eup %1951 }
0x1467   :  { %v1009_v63 = vmul.f32 %v1952_v60, %v1007_v40  ;;  %v1860_v40 = vpack.c.bf16 %v1248_v59, %v1247_v57 }
0x14ca   :  { %v1012_v61 = vpop.permute.xlu0 %1011 }
0x14cb   :  { %v1014_v62 = vmul.f32 %v1952_v60, %v1012_v61  ;;  %v1327_v61 = vld [vmem:[#allocation5 + $0x68] sm:$0xff] }
0x14cd   :  { %1016 = vrot.lane.b32.xlu1 %v1014_v62, %s2019_s3 }
0x153f   :  { %v1017_v0 = vpop.permute.xlu1 %1016 }
0x1540   :  { %v1019_v3 = vadd.f32 %v1017_v0, %v1009_v63  ;;  %v1328_v63 = vld [vmem:[#allocation5 + $0x70] sm:$0xff]  ;;  %v1329_v0 = vld [vmem:[#allocation5 + $0x78] sm:$0xff] }
0x1542   :  { %1953 = vtanh.f32 %v1019_v3  ;;  %v1866_v3 = vpack.c.bf16 %v1329_v0, %v1328_v63 }
0x154c   :  { %v1954_v4 = vpop.eup %1953 }
0x154d   :  { %1022 = vrot.lane.b32.xlu0 %v1954_v4, %s2018_s20 }
0x15bf   :  { %v1023_v5 = vpop.permute.xlu0 %1022 }
0x15c0   :  { %v1025_v6 = vmul.f32 %v1952_v60, %v1023_v5  ;;  %v1326_v60 = vld [vmem:[#allocation5 + $0x60] sm:$0xff] }
0x15c1   :  { %v1863_v62 = vpack.c.bf16 %v1327_v61, %v1326_v60 }
0x15c2   :  { %v1027_v7 = vrot.slane %v1025_v6, 4 }
0x15c4   :  { %v1029_v8 = vadd.f32 %v1027_v7, %v918_v49  ;;  %v1030_v9 = vmax.f32 %v919_v50, %v1027_v7 }
0x15c6   :  { %v1031_v11 = vmul.f32 0.125, %v1029_v8  ;;  %v1051_v12 = vmul.f32 %v1030_v9, %v1030_v9  ;;  %v1038_v13 = vrot.slane %v1030_v9, 2 }
0x15c8   :  { %1053 = vrot.lane.b32.xlu0 %v1051_v12, %s2019_s3  ;;  %v1042_v14 = vmul.f32 %v1031_v11, %v1031_v11  ;;  %v1033_v10 = vrot.slane %v1031_v11, 2  ;;  %v2248_v16 = vmul.f32 %v1038_v13, %v1030_v9  ;;  %v1040_v27 = vsub.f32 %v1030_v9, %v1038_v13  ;;  %v1415_v13 = vld [vmem:[%s2315_s6] sm:$0xff] }
0x15ca   :  { %1044 = vrot.lane.b32.xlu1 %v1042_v14, %s2019_s3  ;;  %v2251_v18 = vmul.f32 %v1033_v10, %v1031_v11  ;;  %v1041_v34 = vand.u32 2147483647, %v1040_v27  ;;  %v1035_v35 = vsub.f32 %v1031_v11, %v1033_v10  ;;  %v1416_v14 = vld [vmem:[%s2315_s6 + $0x8] sm:$0xff] }
0x15cb   :  { %v1869_v10 = vpack.c.bf16 %v1416_v14, %v1415_v13 }
0x15cc   :  { %v1036_v41 = vand.u32 2147483647, %v1035_v35 }
0x163a   :  { %v1054_v19 = vpop.permute.xlu0 %1053 }
0x163b   :  { %v1064_v20 = vsel %vm1060_vm2, %v1054_v19, 0.0  ;;  %v1056_v23 = vsel %vm1047_vm3, %v1054_v19, 0.0  ;;  %v1417_v19 = vld [vmem:[%s2315_s6 + $0x10] sm:$0xff] }
0x163c   :  { %1065 = vadd.xlane.f32.xlu0 %v1064_v20  ;;  %v1045_v15 = vpop.permute.xlu1 %1044  ;;  %v1418_v20 = vld [vmem:[%s2315_s6 + $0x18] sm:$0xff] }
0x163d   :  { %v1061_v21 = vsel %vm1060_vm2, %v1045_v15, 0.0  ;;  %v1048_v22 = vsel %vm1047_vm3, %v1045_v15, 0.0  ;;  %v1872_v15 = vpack.c.bf16 %v1418_v20, %v1417_v19 }
0x163e   :  { %1062 = vadd.xlane.f32.xlu1 %v1061_v21  ;;  %v1420_v21 = vld [vmem:[%s2315_s6 + $0x28] sm:$0xff] }
0x1640   :  { %1049 = vadd.xlane.f32.xlu0 %v1048_v22 }
0x1642   :  { %1057 = vadd.xlane.f32.xlu1 %v1056_v23  ;;  %v1421_v23 = vld [vmem:[%s2315_s6 + $0x30] sm:$0xff] }
0x1643   :  { %v1878_v25 = vpack.c.bf16 %v1422_v24, %v1421_v23 }
0x1653   :  { %1095 = vrot.lane.b32.xlu1 %v1041_v34, %s2019_s3  ;;  %v1543_v34 = vld [vmem:[#allocation2] ss:$0 sm:$0xff] }
0x1657   :  { %1170 = vrot.lane.b32.xlu1 %v1036_v41, %s2019_s3 }
0x16c9   :  { %v1066_v43 = vpop.xlane.xlu0 %1065 }
0x16cb   :  { %v1063_v44 = vpop.xlane.xlu1 %1062 }
0x16cc   :  { %v1067_v45 = vadd.f32 %v1066_v43, %v1063_v44 }
0x16cd   :  { %v1050_v39 = vpop.xlane.xlu0 %1049 }
0x16ce   :  { %v1070_v17 = vadd.f32 1e-12, %v1067_v45 }
0x16cf   :  { %v1058_v46 = vpop.xlane.xlu1 %1057 }
0x16d0   :  { %1955 = vrsqrt.f32 %v1070_v17  ;;  %v1059_v47 = vadd.f32 %v1058_v46, %v1050_v39 }
0x16d2   :  { %v1068_v48 = vadd.f32 1e-12, %v1059_v47 }
0x16d3   :  { %v1096_v49 = vpop.permute.xlu1 %1095 }
0x16d4   :  { %1957 = vrsqrt.f32 %v1068_v48  ;;  %1734 = vmatmul.mubr.msk.f32.vlgmr.msra.gmra.mrb[8].mxu1 %vm78_vm1, %v1096_v49 }
0x16d5   :  { %1755 = vmatprep.mubr.msk.f32.mxu1 %vm2016_vm0, %v2017_v2  ;;  %1858 = vmatpush3.bf16.msra.mxu1 %v1857_v58 }
0x16d6   :  { %1859 = vmatprep.subr.bf16.mxu1 %v2015_v1 }
0x16d7   :  { %v1171_v50 = vpop.permute.xlu1 %1170 }
0x16d8   :  { %1745 = vmatmul.mubr.msk.f32.vlgmr.msra.gmra.mrb[12].mxu0 %vm78_vm1, %v1171_v50 }
0x16d9   :  { %1766 = vmatprep.mubr.msk.f32.mxu0 %vm2016_vm0, %v2017_v2  ;;  %1864 = vmatpush3.bf16.msra.mxu0 %v1863_v62 }
0x16da   :  { %v1956_v51 = vpop.eup %1955  ;;  %1865 = vmatprep.subr.bf16.mxu0 %v2015_v1  ;;  %1861 = vmatpush3.bf16.msra.mxu1 %v1860_v40 }
0x16db   :  { %v1073_v52 = vrot.slane %v1956_v51, 2  ;;  %1868 = vmatprep.subr.bf16.mxu1 %v2015_v1 }
0x16dd   :  { %1867 = vmatpush3.bf16.msra.mxu0 %v1866_v3 }
0x16de   :  { %v1958_v53 = vpop.eup %1957 }
0x16df   :  { %v1075_v54 = vmul.f32 %v1958_v53, %v1073_v52 }
0x16e1   :  { %1079 = vperm.xlu0 %1890, %v1075_v54  }
0x1760   :  { %v1080_v4 = vpop.permute.xlu0 %1079 }
0x1761   :  { %v1082_v5 = vmul.f32 %v1080_v4, %v2251_v18  ;;  %v1084_v6 = vmul.f32 %v2248_v16, %v1080_v4 }
0x1763   :  { %1250 = vrot.lane.b32.xlu1 %v1082_v5, %s2019_s3 }
0x1767   :  { %1331 = vrot.lane.b32.xlu1 %v1084_v6, %s2019_s3 }
0x17a7   :  { %v1165_v7 = vpop.f32.mrb[8].mxu1 }
0x17a8   :  { %v1735_v8 = vpop.f32.mrb[9].mxu1 }
0x17ab   :  { %v1240_v9 = vpop.f32.mrb[12].mxu0 }
0x17ac   :  { %v1241_v11 = vadd.f32 %v1240_v9, %v1165_v7  ;;  %v1746_v12 = vpop.f32.mrb[13].mxu0 }
0x17d5   :  { %v1251_v18 = vpop.permute.xlu1 %1250 }
0x17d6   :  { %1756 = vmatmul.mubr.msk.f32.vlgmr.msra.gmra.mrb[10].mxu1 %vm78_vm1, %v1251_v18 }
0x17d7   :  { %1870 = vmatpush3.bf16.msra.mxu1 %v1869_v10  ;;  %1785 = vmatprep.mubr.msk.f32.mxu1 %vm2016_vm0, %v2017_v2  ;;  %v1419_v2 = vld [vmem:[%s2315_s6 + $0x20] sm:$0xff] }
0x17d8   :  { %1871 = vmatprep.subr.bf16.mxu1 %v2015_v1  ;;  %v1875_v22 = vpack.c.bf16 %v1420_v21, %v1419_v2 }
0x17d9   :  { %v1332_v16 = vpop.permute.xlu1 %1331 }
0x17da   :  { %1767 = vmatmul.mubr.msk.f32.vlgmr.msra.gmra.mrb[14].mxu0 %vm78_vm1, %v1332_v16 }
0x17db   :  { %1873 = vmatpush3.bf16.msra.mxu1 %v1872_v15 }
0x17dc   :  { %1874 = vmatprep.subr.bf16.mxu1 %v2015_v1 }
0x17df   :  { %1876 = vmatpush3.bf16.msra.mxu1 %v1875_v22 }
0x17e0   :  { %1877 = vmatprep.subr.bf16.mxu1 %v2015_v1 }
0x17e3   :  { %1879 = vmatpush3.bf16.msra.mxu1 %v1878_v25 }
0x18a9   :  { %v1320_v26 = vpop.f32.mrb[10].mxu1 }
0x18aa   :  { %v1324_v27 = vadd.f32 %v1320_v26, %v1241_v11  ;;  %v1757_v28 = vpop.f32.mrb[11].mxu1 }
0x18ad   :  { %v1401_v29 = vpop.f32.mrb[14].mxu0 }
0x18ae   :  { %v1405_v31 = vadd.f32 %v1401_v29, %v1324_v27  ;;  %v1768_v1 = vpop.f32.mrb[15].mxu0 }
0x18b0   :  { %v1413_v32 = vadd.f32 %v1542_v30, %v1405_v31 }
0x18b2   :  { %v1414_v33 = vmax.f32 %v1413_v32, 0.0 }
0x18b4   :  { %1786 = vmatmul.mubr.msk.f32.vlgmr.msra.gmra.mrb[12].mxu1 %vm1430_vm4, %v1414_v33 }
0x1987   :  { %v1500_v35 = vpop.f32.mrb[12].mxu1 }
0x1988   :  { %v1501_v36 = vadd.f32 %v1543_v34, %v1500_v35  ;;  %v1787_v37 = vpop.f32.mrb[13].mxu1 }
0x198a   :  { %v1545_v38 = vmul.f32 -1.442695, %v1501_v36 }
0x198c   :  { %1959 = vpow2.f32 %v1545_v38 }
0x1996   :  { %v1960_v41 = vpop.eup %1959 }
0x1997   :  { %v1507_v42 = vadd.f32 1.0, %v1960_v41 }
0x1999   :  { %1961 = vrcp.f32 %v1507_v42 }
0x19a3   :  { %v1962_v43 = vpop.eup %1961 }
0x19a4   :  { %1511 = vst.msk [vmem:[%s2317_s8] sm:$0x3] %vm1510_vm5, %v1962_v43 }
0x19a5   :  { %1516 = vsyncpa [#allocation4], 1 }
0x19a6   :  { %1517 = vsyncpa [#allocation6], 1 }

</bundles_post_ra>
